<compile_context>
chip_gen: v7x
topology: tpu7x:2x2x1
jax: 0.10.0
libtpu: 0.0.40
codegen_flags: <defaults>
</compile_context>

<pallas_src>
import math

import jax
import jax.numpy as jnp
from jax.experimental import pallas as pl
from jax.experimental.pallas import tpu as pltpu


def _pe_add_kernel(x_ref, pe_ref, o_ref):
    # Elementwise add; pe broadcasts over the (sublane) batch dim in the folded 2D path.
    o_ref[...] = x_ref[...] + pe_ref[...]


def make_pe_table(seq_len: int, d_model: int, dtype=jnp.float32) -> jnp.ndarray:
    """Builds the (1, seq_len, d_model) sinusoidal positional-encoding buffer."""
    position = jnp.arange(seq_len, dtype=jnp.float32)[:, None]                 # (S, 1)
    div_term = jnp.exp(
        jnp.arange(0, d_model, 2, dtype=jnp.float32) * (-math.log(10000.0) / d_model)
    )                                                                           # (D/2,)
    angles = position * div_term                                                # (S, D/2)
    pe = jnp.zeros((seq_len, d_model), dtype=jnp.float32)
    pe = pe.at[:, 0::2].set(jnp.sin(angles))
    pe = pe.at[:, 1::2].set(jnp.cos(angles))
    return pe[None, :, :].astype(dtype)                                         # (1, S, D)


def _sublane_align(itemsize: int) -> int:
    # Native sublane packing: (8,128) f32, (16,128) bf16, (32,128) int8/fp8.
    return 32 if itemsize == 1 else (16 if itemsize == 2 else 8)


def _pick_tile(n: int, target: int, align: int) -> int:
    """Largest tile <= min(n, target): full extent when it fits, else a multiple of
    `align`, preferring one that divides n exactly (avoids a masked tail tile)."""
    if n <= target:
        return n
    t = max(align, (target // align) * align)
    d = t
    while d >= align:
        if n % d == 0:
            return d
        d -= align
    return t


def _hw_config():
    """Generation-aware (block_bytes, vmem_limit_bytes). Defaults are safe on v7x."""
    block_bytes, vmem_limit = 4 << 20, 40 << 20          # fits v7x 64 MiB physical VMEM
    try:
        vmem_cap = getattr(pltpu.get_tpu_info(), "vmem_capacity_bytes", None)
        if vmem_cap is not None and vmem_cap >= 100 * (1 << 20):
            # v5e / v6e: 128 MiB VMEM -> bigger blocks, higher scoped limit.
            block_bytes, vmem_limit = 6 << 20, 96 << 20
    except Exception:
        pass
    return block_bytes, vmem_limit


def positional_encoding_forward(x: jnp.ndarray, pe: jnp.ndarray, *, donate_x: bool = False
                                ) -> jnp.ndarray:
    """x: (B, S, D); pe: (1, seq_len, D) with seq_len >= S. Returns x + pe[:, :S, :].

    Dropout is eval-mode identity. Set donate_x=True ONLY when x is donated into the
    surrounding jax.jit (donate_argnums); otherwise XLA inserts a defensive copy and the
    in-place aliasing buys nothing.
    """
    B, S, D = x.shape
    seq_len = pe.shape[1]
    assert pe.shape[0] == 1 and pe.shape[2] == D and seq_len >= S
    pe = pe.astype(x.dtype)  # no-op if already built in the activation dtype

    itemsize = jnp.dtype(x.dtype).itemsize
    align = _sublane_align(itemsize)
    block_bytes, vmem_limit = _hw_config()
    cost = pl.CostEstimate(
        flops=B * S * D,
        transcendentals=0,
        bytes_accessed=(2 * B * S * D + S * D) * itemsize,  # PE read once (resident block)
    )
    cparams = dict(vmem_limit_bytes=vmem_limit)

    if D % 128 == 0:
        # ---- 3D lane-dense path. Grid = (seq_tiles, batch), batch innermost: the PE
        # block index (0, s, 0) is unchanged across consecutive steps, so Pallas skips
        # the PE refetch and it is streamed from HBM once instead of B times. ----------
        target_rows = max(align, block_bytes // (D * itemsize))
        TS = _pick_tile(S, target_rows, align)
        grid = (pl.cdiv(S, TS), B)
        return pl.pallas_call(
            _pe_add_kernel,
            out_shape=jax.ShapeDtypeStruct((B, S, D), x.dtype),
            grid_spec=pltpu.PrefetchScalarGridSpec(
                num_scalar_prefetch=0,
                grid=grid,
                in_specs=[
                    pl.BlockSpec((1, TS, D), lambda s, b: (b, s, 0)),
                    pl.BlockSpec((1, TS, D), lambda s, b: (0, s, 0)),  # resident across b
                ],
                out_specs=pl.BlockSpec((1, TS, D), lambda s, b: (b, s, 0)),
            ),
            compiler_params=pltpu.CompilerParams(
                dimension_semantics=("parallel", "arbitrary"), **cparams
            ),
            cost_estimate=cost,
            input_output_aliases=({0: 0} if donate_x else {}),
        )(x, pe)

    # ---- D not a multiple of 128: fold (S, D) into one lane-dense trailing axis. -----
    LANE = 128
    F = S * D
    x_flat = x.reshape(B, F)
    pe_flat = pe[:, :S, :].reshape(1, F)   # S*D-element slice: negligible vs activations
    F_pad = ((F + LANE - 1) // LANE) * LANE

    if B == 1:
        # Fast path: fully (8,128)-dense 2D slab (no 8x sublane padding, contiguous DMA).
        L = 1024 if F >= 1024 else F_pad
        F_pad = ((F + L - 1) // L) * L
        padn = F_pad - F
        xf = jnp.pad(x_flat, ((0, 0), (0, padn))) if padn else x_flat
        pf = jnp.pad(pe_flat, ((0, 0), (0, padn))) if padn else pe_flat
        R = F_pad // L
        x2, p2 = xf.reshape(R, L), pf.reshape(R, L)
        target_rows = max(align, block_bytes // (L * itemsize))
        TR = _pick_tile(R, target_rows, align)
        out2 = pl.pallas_call(
            _pe_add_kernel,
            out_shape=jax.ShapeDtypeStruct((R, L), x.dtype),
            grid_spec=pltpu.PrefetchScalarGridSpec(
                num_scalar_prefetch=0,
                grid=(pl.cdiv(R, TR),),
                in_specs=[pl.BlockSpec((TR, L), lambda i: (i, 0)),
                          pl.BlockSpec((TR, L), lambda i: (i, 0))],
                out_specs=pl.BlockSpec((TR, L), lambda i: (i, 0)),
            ),
            compiler_params=pltpu.CompilerParams(
                dimension_semantics=("parallel",), **cparams
            ),
            cost_estimate=cost,
        )(x2, p2)
        return out2.reshape(1, F_pad)[:, :F].reshape(B, S, D)

    # General small-D path: (B, T) blocks over a zero-padded (tileable) flat axis.
    padn = F_pad - F
    xf = jnp.pad(x_flat, ((0, 0), (0, padn))) if padn else x_flat
    pf = jnp.pad(pe_flat, ((0, 0), (0, padn))) if padn else pe_flat
    padded_B = ((B + align - 1) // align) * align          # honest VMEM sublane footprint
    target = max(LANE, (block_bytes // (padded_B * itemsize)) // LANE * LANE)
    T = _pick_tile(F_pad, target, LANE)
    out_flat = pl.pallas_call(
        _pe_add_kernel,
        out_shape=jax.ShapeDtypeStruct((B, F_pad), x.dtype),
        grid_spec=pltpu.PrefetchScalarGridSpec(
            num_scalar_prefetch=0,
            grid=(pl.cdiv(F_pad, T),),
            in_specs=[pl.BlockSpec((B, T), lambda i: (0, i)),
                      pl.BlockSpec((1, T), lambda i: (0, i))],
            out_specs=pl.BlockSpec((B, T), lambda i: (0, i)),
        ),
        compiler_params=pltpu.CompilerParams(
            dimension_semantics=("parallel",), **cparams
        ),
        cost_estimate=cost,
        input_output_aliases=({0: 0} if (donate_x and padn == 0) else {}),
    )(xf, pf)
    return out_flat[:, :F].reshape(B, S, D)


if __name__ == "__main__":
    dropout_p = 0.1  # unused: eval-mode dropout is identity

    key = jax.random.PRNGKey(0)
    k0, k1, k2, k3 = jax.random.split(key, 4)

    def check(B, S, D, seq_len, kx):
        x = jax.random.normal(kx, (B, S, D), dtype=jnp.float32)
        pe = make_pe_table(seq_len=seq_len, d_model=D, dtype=x.dtype)
        y_ref = x + pe[:, :S, :]
        y = jax.block_until_ready(positional_encoding_forward(x, pe))
        assert y.shape == (B, S, D)
        assert jnp.allclose(y, y_ref, atol=1e-6, rtol=1e-6), f"mismatch for {(B, S, D)}"

    # Module-sized demo (batch=2, seq=8, d_model=32) plus coverage of every code path.
    check(2, 8, 32, 16, k0)    # folded 2D path (D < 128), no padding needed
    check(1, 8, 32, 16, k1)    # B == 1 dense-slab fast path
    check(2, 8, 128, 16, k2)   # lane-dense 3D path (resident PE block across batch)
    check(3, 7, 20, 16, k3)    # F % 128 != 0 -> zero-padded flat axis

    print("KERNEL_OK")
</pallas_src>

<mosaic_0001>
module attributes {stable_mosaic.version = 11 : i64} {
  func.func @_pe_add_kernel(%arg0: i32, %arg1: memref<2x256xf32, #tpu.memory_space<vmem>>, %arg2: memref<1x256xf32, #tpu.memory_space<vmem>>, %arg3: memref<2x256xf32, #tpu.memory_space<vmem>>) attributes {dimension_semantics = [#tpu.dimension_semantics<parallel>], iteration_bounds = array<i64: 1>, scalar_prefetch = 0 : i64, scratch_operands = 0 : i64, tpu.core_type = #tpu.core_type<tc>, window_params = [{transform_indices = @transform_0, window_bounds = array<i64: 2, 256>}, {transform_indices = @transform_1, window_bounds = array<i64: 1, 256>}, {transform_indices = @transform_2, window_bounds = array<i64: 2, 256>}]} {
    %c0 = arith.constant 0 : index
    %c0_0 = arith.constant 0 : index
    %0 = vector.load %arg1[%c0, %c0_0] : memref<2x256xf32, #tpu.memory_space<vmem>>, vector<2x256xf32>
    %c0_1 = arith.constant 0 : index
    %c0_2 = arith.constant 0 : index
    %1 = vector.load %arg2[%c0_1, %c0_2] : memref<1x256xf32, #tpu.memory_space<vmem>>, vector<1x256xf32>
    %2 = vector.broadcast %1 : vector<1x256xf32> to vector<2x256xf32>
    %3 = arith.addf %0, %2 : vector<2x256xf32>
    %c0_3 = arith.constant 0 : index
    %c0_4 = arith.constant 0 : index
    %4 = vector.load %arg3[%c0_3, %c0_4] : memref<2x256xf32, #tpu.memory_space<vmem>>, vector<2x256xf32>
    tpu.vector_store %arg3[%c0_3, %c0_4], %3 {strides = array<i32>} : memref<2x256xf32, #tpu.memory_space<vmem>>, vector<2x256xf32>,
    return
  }
  func.func @transform_0(%arg0: i32) -> (i32, i32) {
    %c0_i32 = arith.constant 0 : i32
    %c0_i32_0 = arith.constant 0 : i32
    return %c0_i32, %arg0 : i32, i32
  }
  func.func @transform_1(%arg0: i32) -> (i32, i32) {
    %c0_i32 = arith.constant 0 : i32
    %c0_i32_0 = arith.constant 0 : i32
    return %c0_i32, %arg0 : i32, i32
  }
  func.func @transform_2(%arg0: i32) -> (i32, i32) {
    %c0_i32 = arith.constant 0 : i32
    %c0_i32_0 = arith.constant 0 : i32
    return %c0_i32, %arg0 : i32, i32
  }
}

</mosaic_0001>

<bundles_post_ra>
// kernel: tpu_custom_call.1
= control target key start
LH: loop header
LB: loop body
LE: loop exit
PB: predicated region body
PF: predicated region fallthrough
CT: control target
= control target key end

     0   :  { %7 = vsyncpa [#allocation3], 0  ;;  %s157_s0 = inlined_call_operand.hbm [shape: f32[2,256], index: 0, kind: input, shape index: {}]   ;;  %s158_s1 = inlined_call_operand.vmem [shape: f32[1,256], index: 1, kind: input, shape index: {}]   ;;  %s159_s2 = inlined_call_operand.hbm [shape: f32[2,256], index: 2, kind: output, shape index: {}]  }
   0x1   :  { %8 = vsyncpa [#allocation4], 0  ;;  %s112_s9 = smov [#allocation2]   ;;  %s64_s13 = scalar_lea.hbm %s157_s0, 64 }
   0x2   :  { %s15_s10 = sshll.u32 %s112_s9, 4  ;;  %p65_p0 = scmp.ne.s32.totalorder %s157_s0, %s64_s13  ;;  %s16_s10 = int_to_ptr.vmem [resolvable:$true] %s15_s10 }
   0x3   :  { %p68_p1 = scmp.lt.u32.totalorder %s64_s13, %s157_s0 }
   0x5   :  { %p70_p2 = pnand %p68_p1, %p65_p0 }
   0x7   :  { %73 = shalt.err (!%p70_p2)
}
   0x8   :  { %s74_s18 = scalar_lea.vmem %s16_s10, 64  ;;  %p79_p4 = scmp.lt.s32.totalorder %s16_s10, %s16_s10 }
   0x9   :  { %p75_p3 = scmp.ne.s32.totalorder %s16_s10, %s74_s18  ;;  %p80_p5 = scmp.lt.s32.totalorder %s74_s18, %s74_s18 }
   0xb   :  { %p81_p6 = por %p80_p5, %p79_p4 }
   0xd   :  { %p82_p7 = pnand %p81_p6, %p75_p3 }
   0xf   :  { %85 = shalt.err (!%p82_p7)
}
  0x10   :  { %18 = dma.hbm_to_vmem [thread:$0]  %s157_s0, 64, %s16_s10, [#allocation3]  }
  0x11   :  { %108 = dma.done.wait [#allocation3], 64  }
  0x12   :  { %109 = vsyncadd [#allocation3], 4294967232  ;;  %v27_v0 = vlaneseq  ;;  %v113_v1 = vmov 1983009808   ;;  %v25_v7 = vld [vmem:[%s158_s1] sm:$0x3] }
  0x13   :  { %v37_v2 = vunpack.c.l.s4 %v113_v1  ;;  %v24_v12 = vld [vmem:[#allocation2] sm:$0xf]  ;;  %s114_s23 = smov [#allocation5]  }
  0x14   :  { %v28_v3 = vshrl.u32 %v27_v0, 7  ;;  %s52_s0 = sshll.u32 %s114_s23, 4  ;;  %s53_s0 = int_to_ptr.vmem [resolvable:$true] %s52_s0 }
  0x15   :  { %v38_v6 = vunpack.c.0.s8 %v37_v2  ;;  %s86_s24 = scalar_lea.vmem %s53_s0, 64  ;;  %p91_p9 = scmp.lt.s32.totalorder %s53_s0, %s53_s0 }
  0x16   :  { %v29_v4 = vsub.s32 0, %v28_v3  ;;  %v33_v5 = vsub.s32 1, %v28_v3  ;;  %p87_p8 = scmp.ne.s32.totalorder %s53_s0, %s86_s24  ;;  %p92_p10 = scmp.lt.s32.totalorder %s86_s24, %s86_s24 }
  0x17   :  { %v41_v10 = vsub.s32 %v38_v6, %v28_v3 }
  0x18   :  { %v30_v8 = vrot.slane %v25_v7, %v29_v4  ;;  %v34_v9 = vrot.slane %v25_v7, %v33_v5  ;;  %p93_p11 = por %p92_p10, %p91_p9 }
  0x1a   :  { %v35_v11 = vcombine.low %v30_v8, %v34_v9  ;;  %p94_p12 = pnand %p93_p11, %p87_p8 }
  0x1c   :  { %v42_v13 = vrot.slane %v35_v11, %v41_v10 }
  0x1e   :  { %v44_v14 = vadd.f32 %v42_v13, %v24_v12 }
  0x20   :  { %45 = vst [vmem:[#allocation5] sm:$0xf] %v44_v14 }
  0x21   :  { %97 = shalt.err (!%p94_p12)
}
  0x22   :  { %s98_s26 = scalar_lea.hbm %s159_s2, 64 }
  0x23   :  { %p99_p13 = scmp.ne.s32.totalorder %s159_s2, %s98_s26  ;;  %p102_p0 = scmp.lt.u32.totalorder %s98_s26, %s159_s2 }
  0x25   :  { %p104_p1 = pnand %p102_p0, %p99_p13 }
  0x27   :  { %107 = shalt.err (!%p104_p1)
}
  0x28   :  { %55 = dma.vmem_to_hbm [thread:$0]  %s53_s0, 64, %s159_s2, [#allocation4]  }
  0x29   :  { %110 = dma.done.wait [#allocation4], 64  }
  0x2a   :  { %111 = vsyncadd [#allocation4], 4294967232 }
  0x2b   :  { %59 = vsyncpa [#allocation3], 1 }
  0x2c   :  { %60 = vsyncpa [#allocation4], 1 }

</bundles_post_ra>
